<compile_context>
chip_gen: v7x
topology: tpu7x:2x2x1
jax: 0.10.0
libtpu: 0.0.40
codegen_flags: <defaults>
</compile_context>

<pallas_src>
import functools

import jax
import jax.numpy as jnp
from jax import lax
from jax.experimental import pallas as pl
from jax.experimental.pallas import tpu as pltpu

_LANES = 128
_SUBLANES = 8


def _rnn_fc_kernel(n_layers, T, Bp, *refs):
    """Single invocation processes the whole sequence, layer-major.

    refs layout:
      x_ref (T*Bp, I),
      per layer: w_ih (in,H), w_hh (H,H), b (1,H)   [b = b_ih + b_hh],
      w_fc (H,Op), b_fc (1,Op)                      [Op = output_size padded to 128],
      out_ref (T*Bp, Op), h_final_ref (n_layers, Bp, H),
      scratch: proj_ref (T*Bp, H), hseq_ref (T*Bp, H)
    """
    x_ref = refs[0]
    layer_refs = refs[1:1 + 3 * n_layers]
    w_fc_ref = refs[1 + 3 * n_layers]
    b_fc_ref = refs[2 + 3 * n_layers]
    out_ref = refs[3 + 3 * n_layers]
    h_final_ref = refs[4 + 3 * n_layers]
    proj_ref = refs[5 + 3 * n_layers]
    hseq_ref = refs[6 + 3 * n_layers]

    H = hseq_ref.shape[1]
    unroll = T if T <= 16 else 8   # short fixed trip counts -> give LLO visibility

    for l in range(n_layers):
        w_ih = layer_refs[3 * l][...]                  # (in_dim, H)
        w_hh = layer_refs[3 * l + 1][...]              # (H, H)
        b = layer_refs[3 * l + 2][...]                 # (1, H)

        layer_in = x_ref[...] if l == 0 else hseq_ref[...]   # (T*Bp, in_dim)

        # One big GEMM over all timesteps, bias folded in (off the serial path).
        proj_ref[...] = (
            jnp.dot(layer_in, w_ih, preferred_element_type=jnp.float32) + b
        )

        # Serial recurrence: only h_prev @ W_hh remains on the critical path.
        # (per-step (Bp,H) store stays here; with H=32 it is masked but tiny)
        def step(t, h_prev, _w_hh=w_hh):
            r0 = pl.multiple_of(t * Bp, Bp)            # sublane-aligned row offset
            h_new = jnp.maximum(
                proj_ref[pl.ds(r0, Bp), :]
                + jnp.dot(h_prev, _w_hh, preferred_element_type=jnp.float32),
                0.0,
            )
            hseq_ref[pl.ds(r0, Bp), :] = h_new
            return h_new

        h_last = lax.fori_loop(
            0, T, step, jnp.zeros((Bp, H), jnp.float32), unroll=unroll
        )
        h_final_ref[l] = h_last

    # FC head: one GEMM over the whole hidden-sequence slab; Op is a multiple of
    # 128, so this is a single lane-dense, unmasked output store.
    out_ref[...] = (
        jnp.dot(hseq_ref[...], w_fc_ref[...], preferred_element_type=jnp.float32)
        + b_fc_ref[...]
    )


def rnn2_forward(x, params, *, hidden_dim, n_layers, output_size):
    """x: (batch, seq, input_size) float32 (PyTorch batch_first layout).
    Returns (out, hidden): out (batch, seq, output_size),
    hidden (n_layers, batch, hidden_dim)."""
    B, T, I = x.shape
    H, O = hidden_dim, output_size

    # Pad batch up to a sublane multiple (8). Padded rows evolve independently
    # (every matmul is row-wise in the batch) and are dropped at the end.
    Bp = max(_SUBLANES, ((B + _SUBLANES - 1) // _SUBLANES) * _SUBLANES)
    if Bp != B:
        x_p = jnp.zeros((Bp, T, I), x.dtype).at[:B].set(x)
    else:
        x_p = x
    # Time-major, flattened: row index = t*Bp + b.
    x_flat = jnp.transpose(x_p, (1, 0, 2)).reshape(T * Bp, I)

    # Lane-dense FC head: zero-pad output columns up to a multiple of 128 so the
    # kernel's final store is unmasked; slice back to O afterwards.
    Op = max(_LANES, ((O + _LANES - 1) // _LANES) * _LANES)
    w_fc = params["w_fc"]
    b_fc = params["b_fc"]
    if Op != O:
        w_fc = jnp.zeros((H, Op), jnp.float32).at[:, :O].set(w_fc)
        b_fc = jnp.zeros((1, Op), jnp.float32).at[:, :O].set(b_fc)

    operands = [x_flat]
    for l in range(n_layers):
        w_ih, w_hh, b = params["layers"][l]
        operands += [w_ih, w_hh, b]
    operands += [w_fc, b_fc]

    # Whole-array, single-buffered VMEM residency (no grid => no pointless
    # double-buffering of a grid-1 pipeline).
    vmem_spec = pl.BlockSpec(memory_space=pltpu.MemorySpace.VMEM)
    in_specs = [vmem_spec] * len(operands)
    out_specs = (vmem_spec, vmem_spec)
    out_shape = (
        jax.ShapeDtypeStruct((T * Bp, Op), jnp.float32),           # all-timestep outputs
        jax.ShapeDtypeStruct((n_layers, Bp, H), jnp.float32),      # final hidden state
    )

    # Explicit VMEM budget (inputs + outputs + scratch, single-buffered), with
    # headroom for (8,128) layout padding / compiler scratch.  Kept under the
    # smallest physical VMEM (v7x: 64 MiB per TensorCore).
    in_bytes = sum(int(op.size) for op in operands) * 4
    out_bytes = (T * Bp * Op + n_layers * Bp * H) * 4
    scratch_bytes = 2 * T * Bp * H * 4
    needed_bytes = in_bytes + out_bytes + scratch_bytes
    vmem_limit = int(min(60 * 2**20, max(16 * 2**20, 2 * needed_bytes)))

    # Cost estimate so XLA schedules the surrounding transpose/reshape/slice ops
    # around (not serialized with) the custom call.
    flops = 0
    in_dim = I
    for _ in range(n_layers):
        flops += 2 * T * Bp * in_dim * H     # per-layer input-projection GEMM
        flops += 2 * T * Bp * H * H          # per-layer recurrent matmuls
        in_dim = H
    flops += 2 * T * Bp * H * Op             # FC head
    cost = pl.CostEstimate(
        flops=flops, transcendentals=0, bytes_accessed=in_bytes + out_bytes
    )

    kernel = functools.partial(_rnn_fc_kernel, n_layers, T, Bp)
    out_flat, h_final_p = pl.pallas_call(
        kernel,
        out_shape=out_shape,
        in_specs=in_specs,
        out_specs=out_specs,
        scratch_shapes=[
            pltpu.VMEM((T * Bp, H), jnp.float32),   # proj: precomputed input GEMM
            pltpu.VMEM((T * Bp, H), jnp.float32),   # hseq: per-layer hidden sequence
        ],
        compiler_params=pltpu.CompilerParams(vmem_limit_bytes=vmem_limit),
        cost_estimate=cost,
    )(*operands)

    out = jnp.transpose(out_flat[:, :O].reshape(T, Bp, O), (1, 0, 2))[:B]  # (B, T, O)
    hidden = h_final_p[:, :B, :]                                           # (L, B, H)
    return out, hidden


def init_params(key, input_size, hidden_dim, n_layers, output_size):
    """Deterministic init mimicking PyTorch: U(-1/sqrt(H), 1/sqrt(H)).
    Weights stored pre-transposed (in_features, out_features); RNN biases
    pre-summed (b_ih + b_hh)."""
    bound = 1.0 / (hidden_dim ** 0.5)
    layers = []
    for l in range(n_layers):
        key, k1, k2, k3, k4 = jax.random.split(key, 5)
        in_dim = input_size if l == 0 else hidden_dim
        w_ih = jax.random.uniform(k1, (in_dim, hidden_dim), jnp.float32, -bound, bound)
        w_hh = jax.random.uniform(k2, (hidden_dim, hidden_dim), jnp.float32, -bound, bound)
        b_ih = jax.random.uniform(k3, (1, hidden_dim), jnp.float32, -bound, bound)
        b_hh = jax.random.uniform(k4, (1, hidden_dim), jnp.float32, -bound, bound)
        layers.append((w_ih, w_hh, b_ih + b_hh))
    key, k5, k6 = jax.random.split(key, 3)
    w_fc = jax.random.uniform(k5, (hidden_dim, output_size), jnp.float32, -bound, bound)
    b_fc = jax.random.uniform(k6, (1, output_size), jnp.float32, -bound, bound)
    return {"layers": layers, "w_fc": w_fc, "b_fc": b_fc}


def rnn2_reference(x, params, *, hidden_dim, n_layers, output_size):
    """Pure-JAX reference of the same forward pass (for validation)."""
    B, T, I = x.shape
    h = jnp.zeros((n_layers, B, hidden_dim), jnp.float32)

    def step(h, x_t):
        new_h = []
        layer_in = x_t
        for l in range(n_layers):
            w_ih, w_hh, b = params["layers"][l]
            h_new = jnp.maximum(layer_in @ w_ih + h[l] @ w_hh + b, 0.0)
            new_h.append(h_new)
            layer_in = h_new
        h = jnp.stack(new_h, axis=0)
        out_t = layer_in @ params["w_fc"] + params["b_fc"]
        return h, out_t

    h_final, outs = jax.lax.scan(step, h, jnp.transpose(x, (1, 0, 2)))
    return jnp.transpose(outs, (1, 0, 2)), h_final


if __name__ == "__main__":
    # Small shapes consistent with the module's forward: x (batch, seq, input_size).
    batch, seq, input_size = 2, 8, 4
    hidden_dim, n_layers, output_size = 32, 2, 1

    key = jax.random.PRNGKey(0)
    kx, kp = jax.random.split(key)
    x = jax.random.normal(kx, (batch, seq, input_size), jnp.float32)
    params = init_params(kp, input_size, hidden_dim, n_layers, output_size)

    out, hidden = rnn2_forward(
        x, params, hidden_dim=hidden_dim, n_layers=n_layers, output_size=output_size
    )
    out = jax.block_until_ready(out)
    hidden = jax.block_until_ready(hidden)

    # Validate against pure-JAX reference.
    out_ref, hidden_ref = rnn2_reference(
        x, params, hidden_dim=hidden_dim, n_layers=n_layers, output_size=output_size
    )
    assert out.shape == (batch, seq, output_size)
    assert hidden.shape == (n_layers, batch, hidden_dim)
    assert jnp.allclose(out, out_ref, atol=1e-5, rtol=1e-5)
    assert jnp.allclose(hidden, hidden_ref, atol=1e-5, rtol=1e-5)

    print("KERNEL_OK")
</pallas_src>

<mosaic_0001>
module attributes {stable_mosaic.version = 11 : i64} {
  func.func @_rnn_fc_kernel(%arg0: memref<64x4xf32, #tpu.memory_space<vmem>>, %arg1: memref<4x32xf32, #tpu.memory_space<vmem>>, %arg2: memref<32x32xf32, #tpu.memory_space<vmem>>, %arg3: memref<1x32xf32, #tpu.memory_space<vmem>>, %arg4: memref<32x32xf32, #tpu.memory_space<vmem>>, %arg5: memref<32x32xf32, #tpu.memory_space<vmem>>, %arg6: memref<1x32xf32, #tpu.memory_space<vmem>>, %arg7: memref<32x128xf32, #tpu.memory_space<vmem>>, %arg8: memref<1x128xf32, #tpu.memory_space<vmem>>, %arg9: memref<64x128xf32, #tpu.memory_space<vmem>>, %arg10: memref<2x8x32xf32, #tpu.memory_space<vmem>>, %arg11: memref<64x32xf32, #tpu.memory_space<vmem>>, %arg12: memref<64x32xf32, #tpu.memory_space<vmem>>) attributes {dimension_semantics = [], scalar_prefetch = 0 : i64, scratch_operands = 2 : i64, tpu.core_type = #tpu.core_type<tc>} {
    %c0 = arith.constant 0 : index
    %c0_0 = arith.constant 0 : index
    %0 = vector.load %arg1[%c0, %c0_0] : memref<4x32xf32, #tpu.memory_space<vmem>>, vector<4x32xf32>
    %c0_1 = arith.constant 0 : index
    %c0_2 = arith.constant 0 : index
    %1 = vector.load %arg2[%c0_1, %c0_2] : memref<32x32xf32, #tpu.memory_space<vmem>>, vector<32x32xf32>
    %c0_3 = arith.constant 0 : index
    %c0_4 = arith.constant 0 : index
    %2 = vector.load %arg3[%c0_3, %c0_4] : memref<1x32xf32, #tpu.memory_space<vmem>>, vector<1x32xf32>
    %c0_5 = arith.constant 0 : index
    %c0_6 = arith.constant 0 : index
    %3 = vector.load %arg0[%c0_5, %c0_6] : memref<64x4xf32, #tpu.memory_space<vmem>>, vector<64x4xf32>
    %cst = arith.constant dense<0.000000e+00> : vector<64x32xf32>
    %4 = tpu.matmul %3, %0, %cst {dimension_numbers = #tpu.dot_dimension_numbers<[1], [0], [0], [1], [0, 0, 1, 1], [], []>} : vector<64x4xf32>, vector<4x32xf32>, vector<64x32xf32> -> vector<64x32xf32>
    %5 = vector.broadcast %2 : vector<1x32xf32> to vector<64x32xf32>
    %6 = arith.addf %4, %5 : vector<64x32xf32>
    %c0_7 = arith.constant 0 : index
    %c0_8 = arith.constant 0 : index
    %7 = vector.load %arg11[%c0_7, %c0_8] : memref<64x32xf32, #tpu.memory_space<vmem>>, vector<64x32xf32>
    tpu.vector_store %arg11[%c0_7, %c0_8], %6 {strides = array<i32>} : memref<64x32xf32, #tpu.memory_space<vmem>>, vector<64x32xf32>,
    %cst_9 = arith.constant 0.000000e+00 : f32
    %8 = vector.broadcast %cst_9 : f32 to vector<8x32xf32>
    %c0_i32 = arith.constant 0 : i32
    %c8_i32 = arith.constant 8 : i32
    %9 = arith.muli %c0_i32, %c8_i32 : i32
    %10 = tpu.assume_multiple %9, 8 : i32
    %11 = arith.index_cast %10 : i32 to index
    %c0_10 = arith.constant 0 : index
    %12 = vector.load %arg11[%11, %c0_10] : memref<64x32xf32, #tpu.memory_space<vmem>>, vector<8x32xf32>
    %cst_11 = arith.constant dense<0.000000e+00> : vector<8x32xf32>
    %13 = tpu.matmul %8, %1, %cst_11 {dimension_numbers = #tpu.dot_dimension_numbers<[1], [0], [0], [1], [0, 0, 1, 1], [], []>} : vector<8x32xf32>, vector<32x32xf32>, vector<8x32xf32> -> vector<8x32xf32>
    %14 = arith.addf %12, %13 : vector<8x32xf32>
    %cst_12 = arith.constant 0.000000e+00 : f32
    %15 = vector.broadcast %cst_12 : f32 to vector<8x32xf32>
    %16 = arith.maximumf %14, %15 : vector<8x32xf32>
    %17 = arith.index_cast %10 : i32 to index
    %c0_13 = arith.constant 0 : index
    %18 = vector.load %arg12[%17, %c0_13] : memref<64x32xf32, #tpu.memory_space<vmem>>, vector<8x32xf32>
    tpu.vector_store %arg12[%17, %c0_13], %16 {strides = array<i32>} : memref<64x32xf32, #tpu.memory_space<vmem>>, vector<8x32xf32>,
    %c1_i32 = arith.constant 1 : i32
    %c8_i32_14 = arith.constant 8 : i32
    %19 = arith.muli %c1_i32, %c8_i32_14 : i32
    %20 = tpu.assume_multiple %19, 8 : i32
    %21 = arith.index_cast %20 : i32 to index
    %c0_15 = arith.constant 0 : index
    %22 = vector.load %arg11[%21, %c0_15] : memref<64x32xf32, #tpu.memory_space<vmem>>, vector<8x32xf32>
    %cst_16 = arith.constant dense<0.000000e+00> : vector<8x32xf32>
    %23 = tpu.matmul %16, %1, %cst_16 {dimension_numbers = #tpu.dot_dimension_numbers<[1], [0], [0], [1], [0, 0, 1, 1], [], []>} : vector<8x32xf32>, vector<32x32xf32>, vector<8x32xf32> -> vector<8x32xf32>
    %24 = arith.addf %22, %23 : vector<8x32xf32>
    %cst_17 = arith.constant 0.000000e+00 : f32
    %25 = vector.broadcast %cst_17 : f32 to vector<8x32xf32>
    %26 = arith.maximumf %24, %25 : vector<8x32xf32>
    %27 = arith.index_cast %20 : i32 to index
    %c0_18 = arith.constant 0 : index
    %28 = vector.load %arg12[%27, %c0_18] : memref<64x32xf32, #tpu.memory_space<vmem>>, vector<8x32xf32>
    tpu.vector_store %arg12[%27, %c0_18], %26 {strides = array<i32>} : memref<64x32xf32, #tpu.memory_space<vmem>>, vector<8x32xf32>,
    %c2_i32 = arith.constant 2 : i32
    %c8_i32_19 = arith.constant 8 : i32
    %29 = arith.muli %c2_i32, %c8_i32_19 : i32
    %30 = tpu.assume_multiple %29, 8 : i32
    %31 = arith.index_cast %30 : i32 to index
    %c0_20 = arith.constant 0 : index
    %32 = vector.load %arg11[%31, %c0_20] : memref<64x32xf32, #tpu.memory_space<vmem>>, vector<8x32xf32>
    %cst_21 = arith.constant dense<0.000000e+00> : vector<8x32xf32>
    %33 = tpu.matmul %26, %1, %cst_21 {dimension_numbers = #tpu.dot_dimension_numbers<[1], [0], [0], [1], [0, 0, 1, 1], [], []>} : vector<8x32xf32>, vector<32x32xf32>, vector<8x32xf32> -> vector<8x32xf32>
    %34 = arith.addf %32, %33 : vector<8x32xf32>
    %cst_22 = arith.constant 0.000000e+00 : f32
    %35 = vector.broadcast %cst_22 : f32 to vector<8x32xf32>
    %36 = arith.maximumf %34, %35 : vector<8x32xf32>
    %37 = arith.index_cast %30 : i32 to index
    %c0_23 = arith.constant 0 : index
    %38 = vector.load %arg12[%37, %c0_23] : memref<64x32xf32, #tpu.memory_space<vmem>>, vector<8x32xf32>
    tpu.vector_store %arg12[%37, %c0_23], %36 {strides = array<i32>} : memref<64x32xf32, #tpu.memory_space<vmem>>, vector<8x32xf32>,
    %c3_i32 = arith.constant 3 : i32
    %c8_i32_24 = arith.constant 8 : i32
    %39 = arith.muli %c3_i32, %c8_i32_24 : i32
    %40 = tpu.assume_multiple %39, 8 : i32
    %41 = arith.index_cast %40 : i32 to index
    %c0_25 = arith.constant 0 : index
    %42 = vector.load %arg11[%41, %c0_25] : memref<64x32xf32, #tpu.memory_space<vmem>>, vector<8x32xf32>
    %cst_26 = arith.constant dense<0.000000e+00> : vector<8x32xf32>
    %43 = tpu.matmul %36, %1, %cst_26 {dimension_numbers = #tpu.dot_dimension_numbers<[1], [0], [0], [1], [0, 0, 1, 1], [], []>} : vector<8x32xf32>, vector<32x32xf32>, vector<8x32xf32> -> vector<8x32xf32>
    %44 = arith.addf %42, %43 : vector<8x32xf32>
    %cst_27 = arith.constant 0.000000e+00 : f32
    %45 = vector.broadcast %cst_27 : f32 to vector<8x32xf32>
    %46 = arith.maximumf %44, %45 : vector<8x32xf32>
    %47 = arith.index_cast %40 : i32 to index
    %c0_28 = arith.constant 0 : index
    %48 = vector.load %arg12[%47, %c0_28] : memref<64x32xf32, #tpu.memory_space<vmem>>, vector<8x32xf32>
    tpu.vector_store %arg12[%47, %c0_28], %46 {strides = array<i32>} : memref<64x32xf32, #tpu.memory_space<vmem>>, vector<8x32xf32>,
    %c4_i32 = arith.constant 4 : i32
    %c8_i32_29 = arith.constant 8 : i32
    %49 = arith.muli %c4_i32, %c8_i32_29 : i32
    %50 = tpu.assume_multiple %49, 8 : i32
    %51 = arith.index_cast %50 : i32 to index
    %c0_30 = arith.constant 0 : index
    %52 = vector.load %arg11[%51, %c0_30] : memref<64x32xf32, #tpu.memory_space<vmem>>, vector<8x32xf32>
    %cst_31 = arith.constant dense<0.000000e+00> : vector<8x32xf32>
    %53 = tpu.matmul %46, %1, %cst_31 {dimension_numbers = #tpu.dot_dimension_numbers<[1], [0], [0], [1], [0, 0, 1, 1], [], []>} : vector<8x32xf32>, vector<32x32xf32>, vector<8x32xf32> -> vector<8x32xf32>
    %54 = arith.addf %52, %53 : vector<8x32xf32>
    %cst_32 = arith.constant 0.000000e+00 : f32
    %55 = vector.broadcast %cst_32 : f32 to vector<8x32xf32>
    %56 = arith.maximumf %54, %55 : vector<8x32xf32>
    %57 = arith.index_cast %50 : i32 to index
    %c0_33 = arith.constant 0 : index
    %58 = vector.load %arg12[%57, %c0_33] : memref<64x32xf32, #tpu.memory_space<vmem>>, vector<8x32xf32>
    tpu.vector_store %arg12[%57, %c0_33], %56 {strides = array<i32>} : memref<64x32xf32, #tpu.memory_space<vmem>>, vector<8x32xf32>,
    %c5_i32 = arith.constant 5 : i32
    %c8_i32_34 = arith.constant 8 : i32
    %59 = arith.muli %c5_i32, %c8_i32_34 : i32
    %60 = tpu.assume_multiple %59, 8 : i32
    %61 = arith.index_cast %60 : i32 to index
    %c0_35 = arith.constant 0 : index
    %62 = vector.load %arg11[%61, %c0_35] : memref<64x32xf32, #tpu.memory_space<vmem>>, vector<8x32xf32>
    %cst_36 = arith.constant dense<0.000000e+00> : vector<8x32xf32>
    %63 = tpu.matmul %56, %1, %cst_36 {dimension_numbers = #tpu.dot_dimension_numbers<[1], [0], [0], [1], [0, 0, 1, 1], [], []>} : vector<8x32xf32>, vector<32x32xf32>, vector<8x32xf32> -> vector<8x32xf32>
    %64 = arith.addf %62, %63 : vector<8x32xf32>
    %cst_37 = arith.constant 0.000000e+00 : f32
    %65 = vector.broadcast %cst_37 : f32 to vector<8x32xf32>
    %66 = arith.maximumf %64, %65 : vector<8x32xf32>
    %67 = arith.index_cast %60 : i32 to index
    %c0_38 = arith.constant 0 : index
    %68 = vector.load %arg12[%67, %c0_38] : memref<64x32xf32, #tpu.memory_space<vmem>>, vector<8x32xf32>
    tpu.vector_store %arg12[%67, %c0_38], %66 {strides = array<i32>} : memref<64x32xf32, #tpu.memory_space<vmem>>, vector<8x32xf32>,
    %c6_i32 = arith.constant 6 : i32
    %c8_i32_39 = arith.constant 8 : i32
    %69 = arith.muli %c6_i32, %c8_i32_39 : i32
    %70 = tpu.assume_multiple %69, 8 : i32
    %71 = arith.index_cast %70 : i32 to index
    %c0_40 = arith.constant 0 : index
    %72 = vector.load %arg11[%71, %c0_40] : memref<64x32xf32, #tpu.memory_space<vmem>>, vector<8x32xf32>
    %cst_41 = arith.constant dense<0.000000e+00> : vector<8x32xf32>
    %73 = tpu.matmul %66, %1, %cst_41 {dimension_numbers = #tpu.dot_dimension_numbers<[1], [0], [0], [1], [0, 0, 1, 1], [], []>} : vector<8x32xf32>, vector<32x32xf32>, vector<8x32xf32> -> vector<8x32xf32>
    %74 = arith.addf %72, %73 : vector<8x32xf32>
    %cst_42 = arith.constant 0.000000e+00 : f32
    %75 = vector.broadcast %cst_42 : f32 to vector<8x32xf32>
    %76 = arith.maximumf %74, %75 : vector<8x32xf32>
    %77 = arith.index_cast %70 : i32 to index
    %c0_43 = arith.constant 0 : index
    %78 = vector.load %arg12[%77, %c0_43] : memref<64x32xf32, #tpu.memory_space<vmem>>, vector<8x32xf32>
    tpu.vector_store %arg12[%77, %c0_43], %76 {strides = array<i32>} : memref<64x32xf32, #tpu.memory_space<vmem>>, vector<8x32xf32>,
    %c7_i32 = arith.constant 7 : i32
    %c8_i32_44 = arith.constant 8 : i32
    %79 = arith.muli %c7_i32, %c8_i32_44 : i32
    %80 = tpu.assume_multiple %79, 8 : i32
    %81 = arith.index_cast %80 : i32 to index
    %c0_45 = arith.constant 0 : index
    %82 = vector.load %arg11[%81, %c0_45] : memref<64x32xf32, #tpu.memory_space<vmem>>, vector<8x32xf32>
    %cst_46 = arith.constant dense<0.000000e+00> : vector<8x32xf32>
    %83 = tpu.matmul %76, %1, %cst_46 {dimension_numbers = #tpu.dot_dimension_numbers<[1], [0], [0], [1], [0, 0, 1, 1], [], []>} : vector<8x32xf32>, vector<32x32xf32>, vector<8x32xf32> -> vector<8x32xf32>
    %84 = arith.addf %82, %83 : vector<8x32xf32>
    %cst_47 = arith.constant 0.000000e+00 : f32
    %85 = vector.broadcast %cst_47 : f32 to vector<8x32xf32>
    %86 = arith.maximumf %84, %85 : vector<8x32xf32>
    %87 = arith.index_cast %80 : i32 to index
    %c0_48 = arith.constant 0 : index
    %88 = vector.load %arg12[%87, %c0_48] : memref<64x32xf32, #tpu.memory_space<vmem>>, vector<8x32xf32>
    tpu.vector_store %arg12[%87, %c0_48], %86 {strides = array<i32>} : memref<64x32xf32, #tpu.memory_space<vmem>>, vector<8x32xf32>,
    %c8_i32_49 = arith.constant 8 : i32
    %c0_50 = arith.constant 0 : index
    %c0_51 = arith.constant 0 : index
    %c0_52 = arith.constant 0 : index
    %89 = vector.load %arg10[%c0_50, %c0_51, %c0_52] : memref<2x8x32xf32, #tpu.memory_space<vmem>>, vector<1x8x32xf32>
    %90 = vector.shape_cast %89 : vector<1x8x32xf32> to vector<8x32xf32>
    %91 = vector.shape_cast %86 : vector<8x32xf32> to vector<1x8x32xf32>
    tpu.vector_store %arg10[%c0_50, %c0_51, %c0_52], %91 {strides = array<i32>} : memref<2x8x32xf32, #tpu.memory_space<vmem>>, vector<1x8x32xf32>,
    %c0_53 = arith.constant 0 : index
    %c0_54 = arith.constant 0 : index
    %92 = vector.load %arg4[%c0_53, %c0_54] : memref<32x32xf32, #tpu.memory_space<vmem>>, vector<32x32xf32>
    %c0_55 = arith.constant 0 : index
    %c0_56 = arith.constant 0 : index
    %93 = vector.load %arg5[%c0_55, %c0_56] : memref<32x32xf32, #tpu.memory_space<vmem>>, vector<32x32xf32>
    %c0_57 = arith.constant 0 : index
    %c0_58 = arith.constant 0 : index
    %94 = vector.load %arg6[%c0_57, %c0_58] : memref<1x32xf32, #tpu.memory_space<vmem>>, vector<1x32xf32>
    %c0_59 = arith.constant 0 : index
    %c0_60 = arith.constant 0 : index
    %95 = vector.load %arg12[%c0_59, %c0_60] : memref<64x32xf32, #tpu.memory_space<vmem>>, vector<64x32xf32>
    %cst_61 = arith.constant dense<0.000000e+00> : vector<64x32xf32>
    %96 = tpu.matmul %95, %92, %cst_61 {dimension_numbers = #tpu.dot_dimension_numbers<[1], [0], [0], [1], [0, 0, 1, 1], [], []>} : vector<64x32xf32>, vector<32x32xf32>, vector<64x32xf32> -> vector<64x32xf32>
    %97 = vector.broadcast %94 : vector<1x32xf32> to vector<64x32xf32>
    %98 = arith.addf %96, %97 : vector<64x32xf32>
    %c0_62 = arith.constant 0 : index
    %c0_63 = arith.constant 0 : index
    %99 = vector.load %arg11[%c0_62, %c0_63] : memref<64x32xf32, #tpu.memory_space<vmem>>, vector<64x32xf32>
    tpu.vector_store %arg11[%c0_62, %c0_63], %98 {strides = array<i32>} : memref<64x32xf32, #tpu.memory_space<vmem>>, vector<64x32xf32>,
    %cst_64 = arith.constant 0.000000e+00 : f32
    %100 = vector.broadcast %cst_64 : f32 to vector<8x32xf32>
    %c0_i32_65 = arith.constant 0 : i32
    %c8_i32_66 = arith.constant 8 : i32
    %101 = arith.muli %c0_i32_65, %c8_i32_66 : i32
    %102 = tpu.assume_multiple %101, 8 : i32
    %103 = arith.index_cast %102 : i32 to index
    %c0_67 = arith.constant 0 : index
    %104 = vector.load %arg11[%103, %c0_67] : memref<64x32xf32, #tpu.memory_space<vmem>>, vector<8x32xf32>
    %cst_68 = arith.constant dense<0.000000e+00> : vector<8x32xf32>
    %105 = tpu.matmul %100, %93, %cst_68 {dimension_numbers = #tpu.dot_dimension_numbers<[1], [0], [0], [1], [0, 0, 1, 1], [], []>} : vector<8x32xf32>, vector<32x32xf32>, vector<8x32xf32> -> vector<8x32xf32>
    %106 = arith.addf %104, %105 : vector<8x32xf32>
    %cst_69 = arith.constant 0.000000e+00 : f32
    %107 = vector.broadcast %cst_69 : f32 to vector<8x32xf32>
    %108 = arith.maximumf %106, %107 : vector<8x32xf32>
    %109 = arith.index_cast %102 : i32 to index
    %c0_70 = arith.constant 0 : index
    %110 = vector.load %arg12[%109, %c0_70] : memref<64x32xf32, #tpu.memory_space<vmem>>, vector<8x32xf32>
    tpu.vector_store %arg12[%109, %c0_70], %108 {strides = array<i32>} : memref<64x32xf32, #tpu.memory_space<vmem>>, vector<8x32xf32>,
    %c1_i32_71 = arith.constant 1 : i32
    %c8_i32_72 = arith.constant 8 : i32
    %111 = arith.muli %c1_i32_71, %c8_i32_72 : i32
    %112 = tpu.assume_multiple %111, 8 : i32
    %113 = arith.index_cast %112 : i32 to index
    %c0_73 = arith.constant 0 : index
    %114 = vector.load %arg11[%113, %c0_73] : memref<64x32xf32, #tpu.memory_space<vmem>>, vector<8x32xf32>
    %cst_74 = arith.constant dense<0.000000e+00> : vector<8x32xf32>
    %115 = tpu.matmul %108, %93, %cst_74 {dimension_numbers = #tpu.dot_dimension_numbers<[1], [0], [0], [1], [0, 0, 1, 1], [], []>} : vector<8x32xf32>, vector<32x32xf32>, vector<8x32xf32> -> vector<8x32xf32>
    %116 = arith.addf %114, %115 : vector<8x32xf32>
    %cst_75 = arith.constant 0.000000e+00 : f32
    %117 = vector.broadcast %cst_75 : f32 to vector<8x32xf32>
    %118 = arith.maximumf %116, %117 : vector<8x32xf32>
    %119 = arith.index_cast %112 : i32 to index
    %c0_76 = arith.constant 0 : index
    %120 = vector.load %arg12[%119, %c0_76] : memref<64x32xf32, #tpu.memory_space<vmem>>, vector<8x32xf32>
    tpu.vector_store %arg12[%119, %c0_76], %118 {strides = array<i32>} : memref<64x32xf32, #tpu.memory_space<vmem>>, vector<8x32xf32>,
    %c2_i32_77 = arith.constant 2 : i32
    %c8_i32_78 = arith.constant 8 : i32
    %121 = arith.muli %c2_i32_77, %c8_i32_78 : i32
    %122 = tpu.assume_multiple %121, 8 : i32
    %123 = arith.index_cast %122 : i32 to index
    %c0_79 = arith.constant 0 : index
    %124 = vector.load %arg11[%123, %c0_79] : memref<64x32xf32, #tpu.memory_space<vmem>>, vector<8x32xf32>
    %cst_80 = arith.constant dense<0.000000e+00> : vector<8x32xf32>
    %125 = tpu.matmul %118, %93, %cst_80 {dimension_numbers = #tpu.dot_dimension_numbers<[1], [0], [0], [1], [0, 0, 1, 1], [], []>} : vector<8x32xf32>, vector<32x32xf32>, vector<8x32xf32> -> vector<8x32xf32>
    %126 = arith.addf %124, %125 : vector<8x32xf32>
    %cst_81 = arith.constant 0.000000e+00 : f32
    %127 = vector.broadcast %cst_81 : f32 to vector<8x32xf32>
    %128 = arith.maximumf %126, %127 : vector<8x32xf32>
    %129 = arith.index_cast %122 : i32 to index
    %c0_82 = arith.constant 0 : index
    %130 = vector.load %arg12[%129, %c0_82] : memref<64x32xf32, #tpu.memory_space<vmem>>, vector<8x32xf32>
    tpu.vector_store %arg12[%129, %c0_82], %128 {strides = array<i32>} : memref<64x32xf32, #tpu.memory_space<vmem>>, vector<8x32xf32>,
    %c3_i32_83 = arith.constant 3 : i32
    %c8_i32_84 = arith.constant 8 : i32
    %131 = arith.muli %c3_i32_83, %c8_i32_84 : i32
    %132 = tpu.assume_multiple %131, 8 : i32
    %133 = arith.index_cast %132 : i32 to index
    %c0_85 = arith.constant 0 : index
    %134 = vector.load %arg11[%133, %c0_85] : memref<64x32xf32, #tpu.memory_space<vmem>>, vector<8x32xf32>
    %cst_86 = arith.constant dense<0.000000e+00> : vector<8x32xf32>
    %135 = tpu.matmul %128, %93, %cst_86 {dimension_numbers = #tpu.dot_dimension_numbers<[1], [0], [0], [1], [0, 0, 1, 1], [], []>} : vector<8x32xf32>, vector<32x32xf32>, vector<8x32xf32> -> vector<8x32xf32>
    %136 = arith.addf %134, %135 : vector<8x32xf32>
    %cst_87 = arith.constant 0.000000e+00 : f32
    %137 = vector.broadcast %cst_87 : f32 to vector<8x32xf32>
    %138 = arith.maximumf %136, %137 : vector<8x32xf32>
    %139 = arith.index_cast %132 : i32 to index
    %c0_88 = arith.constant 0 : index
    %140 = vector.load %arg12[%139, %c0_88] : memref<64x32xf32, #tpu.memory_space<vmem>>, vector<8x32xf32>
    tpu.vector_store %arg12[%139, %c0_88], %138 {strides = array<i32>} : memref<64x32xf32, #tpu.memory_space<vmem>>, vector<8x32xf32>,
    %c4_i32_89 = arith.constant 4 : i32
    %c8_i32_90 = arith.constant 8 : i32
    %141 = arith.muli %c4_i32_89, %c8_i32_90 : i32
    %142 = tpu.assume_multiple %141, 8 : i32
    %143 = arith.index_cast %142 : i32 to index
    %c0_91 = arith.constant 0 : index
    %144 = vector.load %arg11[%143, %c0_91] : memref<64x32xf32, #tpu.memory_space<vmem>>, vector<8x32xf32>
    %cst_92 = arith.constant dense<0.000000e+00> : vector<8x32xf32>
    %145 = tpu.matmul %138, %93, %cst_92 {dimension_numbers = #tpu.dot_dimension_numbers<[1], [0], [0], [1], [0, 0, 1, 1], [], []>} : vector<8x32xf32>, vector<32x32xf32>, vector<8x32xf32> -> vector<8x32xf32>
    %146 = arith.addf %144, %145 : vector<8x32xf32>
    %cst_93 = arith.constant 0.000000e+00 : f32
    %147 = vector.broadcast %cst_93 : f32 to vector<8x32xf32>
    %148 = arith.maximumf %146, %147 : vector<8x32xf32>
    %149 = arith.index_cast %142 : i32 to index
    %c0_94 = arith.constant 0 : index
    %150 = vector.load %arg12[%149, %c0_94] : memref<64x32xf32, #tpu.memory_space<vmem>>, vector<8x32xf32>
    tpu.vector_store %arg12[%149, %c0_94], %148 {strides = array<i32>} : memref<64x32xf32, #tpu.memory_space<vmem>>, vector<8x32xf32>,
    %c5_i32_95 = arith.constant 5 : i32
    %c8_i32_96 = arith.constant 8 : i32
    %151 = arith.muli %c5_i32_95, %c8_i32_96 : i32
    %152 = tpu.assume_multiple %151, 8 : i32
    %153 = arith.index_cast %152 : i32 to index
    %c0_97 = arith.constant 0 : index
    %154 = vector.load %arg11[%153, %c0_97] : memref<64x32xf32, #tpu.memory_space<vmem>>, vector<8x32xf32>
    %cst_98 = arith.constant dense<0.000000e+00> : vector<8x32xf32>
    %155 = tpu.matmul %148, %93, %cst_98 {dimension_numbers = #tpu.dot_dimension_numbers<[1], [0], [0], [1], [0, 0, 1, 1], [], []>} : vector<8x32xf32>, vector<32x32xf32>, vector<8x32xf32> -> vector<8x32xf32>
    %156 = arith.addf %154, %155 : vector<8x32xf32>
    %cst_99 = arith.constant 0.000000e+00 : f32
    %157 = vector.broadcast %cst_99 : f32 to vector<8x32xf32>
    %158 = arith.maximumf %156, %157 : vector<8x32xf32>
    %159 = arith.index_cast %152 : i32 to index
    %c0_100 = arith.constant 0 : index
    %160 = vector.load %arg12[%159, %c0_100] : memref<64x32xf32, #tpu.memory_space<vmem>>, vector<8x32xf32>
    tpu.vector_store %arg12[%159, %c0_100], %158 {strides = array<i32>} : memref<64x32xf32, #tpu.memory_space<vmem>>, vector<8x32xf32>,
    %c6_i32_101 = arith.constant 6 : i32
    %c8_i32_102 = arith.constant 8 : i32
    %161 = arith.muli %c6_i32_101, %c8_i32_102 : i32
    %162 = tpu.assume_multiple %161, 8 : i32
    %163 = arith.index_cast %162 : i32 to index
    %c0_103 = arith.constant 0 : index
    %164 = vector.load %arg11[%163, %c0_103] : memref<64x32xf32, #tpu.memory_space<vmem>>, vector<8x32xf32>
    %cst_104 = arith.constant dense<0.000000e+00> : vector<8x32xf32>
    %165 = tpu.matmul %158, %93, %cst_104 {dimension_numbers = #tpu.dot_dimension_numbers<[1], [0], [0], [1], [0, 0, 1, 1], [], []>} : vector<8x32xf32>, vector<32x32xf32>, vector<8x32xf32> -> vector<8x32xf32>
    %166 = arith.addf %164, %165 : vector<8x32xf32>
    %cst_105 = arith.constant 0.000000e+00 : f32
    %167 = vector.broadcast %cst_105 : f32 to vector<8x32xf32>
    %168 = arith.maximumf %166, %167 : vector<8x32xf32>
    %169 = arith.index_cast %162 : i32 to index
    %c0_106 = arith.constant 0 : index
    %170 = vector.load %arg12[%169, %c0_106] : memref<64x32xf32, #tpu.memory_space<vmem>>, vector<8x32xf32>
    tpu.vector_store %arg12[%169, %c0_106], %168 {strides = array<i32>} : memref<64x32xf32, #tpu.memory_space<vmem>>, vector<8x32xf32>,
    %c7_i32_107 = arith.constant 7 : i32
    %c8_i32_108 = arith.constant 8 : i32
    %171 = arith.muli %c7_i32_107, %c8_i32_108 : i32
    %172 = tpu.assume_multiple %171, 8 : i32
    %173 = arith.index_cast %172 : i32 to index
    %c0_109 = arith.constant 0 : index
    %174 = vector.load %arg11[%173, %c0_109] : memref<64x32xf32, #tpu.memory_space<vmem>>, vector<8x32xf32>
    %cst_110 = arith.constant dense<0.000000e+00> : vector<8x32xf32>
    %175 = tpu.matmul %168, %93, %cst_110 {dimension_numbers = #tpu.dot_dimension_numbers<[1], [0], [0], [1], [0, 0, 1, 1], [], []>} : vector<8x32xf32>, vector<32x32xf32>, vector<8x32xf32> -> vector<8x32xf32>
    %176 = arith.addf %174, %175 : vector<8x32xf32>
    %cst_111 = arith.constant 0.000000e+00 : f32
    %177 = vector.broadcast %cst_111 : f32 to vector<8x32xf32>
    %178 = arith.maximumf %176, %177 : vector<8x32xf32>
    %179 = arith.index_cast %172 : i32 to index
    %c0_112 = arith.constant 0 : index
    %180 = vector.load %arg12[%179, %c0_112] : memref<64x32xf32, #tpu.memory_space<vmem>>, vector<8x32xf32>
    tpu.vector_store %arg12[%179, %c0_112], %178 {strides = array<i32>} : memref<64x32xf32, #tpu.memory_space<vmem>>, vector<8x32xf32>,
    %c8_i32_113 = arith.constant 8 : i32
    %c1 = arith.constant 1 : index
    %c0_114 = arith.constant 0 : index
    %c0_115 = arith.constant 0 : index
    %181 = vector.load %arg10[%c1, %c0_114, %c0_115] : memref<2x8x32xf32, #tpu.memory_space<vmem>>, vector<1x8x32xf32>
    %182 = vector.shape_cast %181 : vector<1x8x32xf32> to vector<8x32xf32>
    %183 = vector.shape_cast %178 : vector<8x32xf32> to vector<1x8x32xf32>
    tpu.vector_store %arg10[%c1, %c0_114, %c0_115], %183 {strides = array<i32>} : memref<2x8x32xf32, #tpu.memory_space<vmem>>, vector<1x8x32xf32>,
    %c0_116 = arith.constant 0 : index
    %c0_117 = arith.constant 0 : index
    %184 = vector.load %arg12[%c0_116, %c0_117] : memref<64x32xf32, #tpu.memory_space<vmem>>, vector<64x32xf32>
    %c0_118 = arith.constant 0 : index
    %c0_119 = arith.constant 0 : index
    %185 = vector.load %arg7[%c0_118, %c0_119] : memref<32x128xf32, #tpu.memory_space<vmem>>, vector<32x128xf32>
    %cst_120 = arith.constant dense<0.000000e+00> : vector<64x128xf32>
    %186 = tpu.matmul %184, %185, %cst_120 {dimension_numbers = #tpu.dot_dimension_numbers<[1], [0], [0], [1], [0, 0, 1, 1], [], []>} : vector<64x32xf32>, vector<32x128xf32>, vector<64x128xf32> -> vector<64x128xf32>
    %c0_121 = arith.constant 0 : index
    %c0_122 = arith.constant 0 : index
    %187 = vector.load %arg8[%c0_121, %c0_122] : memref<1x128xf32, #tpu.memory_space<vmem>>, vector<1x128xf32>
    %188 = vector.broadcast %187 : vector<1x128xf32> to vector<64x128xf32>
    %189 = arith.addf %186, %188 : vector<64x128xf32>
    %c0_123 = arith.constant 0 : index
    %c0_124 = arith.constant 0 : index
    %190 = vector.load %arg9[%c0_123, %c0_124] : memref<64x128xf32, #tpu.memory_space<vmem>>, vector<64x128xf32>
    tpu.vector_store %arg9[%c0_123, %c0_124], %189 {strides = array<i32>} : memref<64x128xf32, #tpu.memory_space<vmem>>, vector<64x128xf32>,
    return
  }
}

</mosaic_0001>

<bundles_post_ra>
// kernel: tpu_custom_call.1
= control target key start
LH: loop header
LB: loop body
LE: loop exit
PB: predicated region body
PF: predicated region fallthrough
CT: control target
= control target key end

     0   :  { %16 = vsyncpa [#allocation5], 0  ;;  %s2789_s0 = inlined_call_operand.vmem [shape: f32[64,4], index: 0, kind: input, shape index: {}]   ;;  %s2790_s1 = inlined_call_operand.vmem [shape: f32[4,32], index: 1, kind: input, shape index: {}]   ;;  %s2791_s2 = inlined_call_operand.vmem [shape: f32[32,32], index: 2, kind: input, shape index: {}]   ;;  %s2792_s3 = inlined_call_operand.vmem [shape: f32[1,32], index: 3, kind: input, shape index: {}]   ;;  %s2793_s4 = inlined_call_operand.vmem [shape: f32[32,32], index: 4, kind: input, shape index: {}]   ;;  %s2794_s5 = inlined_call_operand.hbm [shape: f32[32,32], index: 5, kind: input, shape index: {}]   ;;  %s2795_s6 = inlined_call_operand.vmem [shape: f32[1,32], index: 6, kind: input, shape index: {}]   ;;  %s2796_s7 = inlined_call_operand.hbm [shape: f32[32,128], index: 7, kind: input, shape index: {}]   ;;  %s2797_s8 = inlined_call_operand.vmem [shape: f32[1,128], index: 8, kind: input, shape index: {}]   ;;  %s2798_s9 = inlined_call_operand.hbm [shape: f32[64,128], index: 9, kind: output, shape index: {0}]   ;;  %s2799_s10 = inlined_call_operand.hbm [shape: f32[2,8,32], index: 10, kind: output, shape index: {1}]  }
   0x1   :  { %17 = vsyncpa [#allocation8], 0 }
   0x2   :  { %18 = vsyncpa [#allocation6], 0 }
   0x3   :  { %19 = vsyncpa [#allocation11], 0  ;;  %s2427_s13 = smov [#allocation4]   ;;  %s2331_s17 = scalar_lea.hbm %s2794_s5, 512 }
   0x4   :  { %s35_s14 = sshll.u32 %s2427_s13, 4  ;;  %p2332_p0 = scmp.ne.s32.totalorder %s2794_s5, %s2331_s17  ;;  %s36_s14 = int_to_ptr.vmem [resolvable:$true] %s35_s14 }
   0x5   :  { %p2335_p1 = scmp.lt.u32.totalorder %s2331_s17, %s2794_s5 }
   0x7   :  { %p2337_p2 = pnand %p2335_p1, %p2332_p0 }
   0x9   :  { %2340 = shalt.err (!%p2337_p2)
}
   0xa   :  { %s2341_s22 = scalar_lea.vmem %s36_s14, 512  ;;  %p2346_p4 = scmp.lt.s32.totalorder %s36_s14, %s36_s14 }
   0xb   :  { %p2342_p3 = scmp.ne.s32.totalorder %s36_s14, %s2341_s22  ;;  %p2347_p5 = scmp.lt.s32.totalorder %s2341_s22, %s2341_s22 }
   0xd   :  { %p2348_p6 = por %p2347_p5, %p2346_p4 }
   0xf   :  { %p2349_p7 = pnand %p2348_p6, %p2342_p3 }
  0x11   :  { %2352 = shalt.err (!%p2349_p7)
}
  0x12   :  { %s2428_s23 = smov 128   ;;  %s2429_s24 = smov 8  }
  0x13   :  { %41 = dma.hbm_to_vmem [thread:$0]  %s2794_s5, 512, %s36_s14, [#allocation5], %s2428_s23, %s2428_s23, %s2429_s24  }
  0x14   :  { %s2430_s27 = smov [#allocation7]   ;;  %s2353_s11 = scalar_lea.hbm %s2796_s7, 512 }
  0x15   :  { %s49_s28 = sshll.u32 %s2430_s27, 4  ;;  %p2354_p8 = scmp.ne.s32.totalorder %s2796_s7, %s2353_s11  ;;  %s50_s28 = int_to_ptr.vmem [resolvable:$true] %s49_s28 }
  0x16   :  { %p2357_p9 = scmp.lt.u32.totalorder %s2353_s11, %s2796_s7 }
  0x18   :  { %p2359_p10 = pnand %p2357_p9, %p2354_p8 }
  0x1a   :  { %2362 = shalt.err (!%p2359_p10)
}
  0x1b   :  { %s2363_s17 = scalar_lea.vmem %s50_s28, 512  ;;  %p2368_p12 = scmp.lt.s32.totalorder %s50_s28, %s50_s28 }
  0x1c   :  { %p2364_p11 = scmp.ne.s32.totalorder %s50_s28, %s2363_s17  ;;  %p2369_p13 = scmp.lt.s32.totalorder %s2363_s17, %s2363_s17 }
  0x1e   :  { %p2370_p0 = por %p2369_p13, %p2368_p12 }
  0x20   :  { %p2371_p1 = pnand %p2370_p0, %p2364_p11 }
  0x22   :  { %2374 = shalt.err (!%p2371_p1)
}
  0x23   :  { %55 = dma.hbm_to_vmem [thread:$0]  %s2796_s7, 512, %s50_s28, [#allocation8], %s2428_s23, %s2428_s23, %s2429_s24  }
  0x24   :  { %2419 = dma.done.wait [#allocation5], 512  }
  0x25   :  { %2420 = vsyncadd [#allocation5], 4294966784 }
  0x26   :  { %2421 = dma.done.wait [#allocation8], 512  }
  0x27   :  { %2422 = vsyncadd [#allocation8], 4294966784  ;;  %vm109_vm0 = vcmask 1043456   ;;  %vm84_vm1 = vcmask 31744   ;;  %v64_v0 = vld [vmem:[%s2790_s1] sm:$0xf] }
  0x28   :  { %v70_v1 = vld [vmem:[%s2789_s0] sm:$0xff]  ;;  %v71_v2 = vld [vmem:[%s2789_s0 + $0x8] sm:$0xff]  ;;  %1978 = vmatprep.subr.msk.mxu0 %vm109_vm0, %v64_v0  ;;  %2320 = vmatprep.subr.msk.mxu1 %vm109_vm0, %v64_v0  ;;  %v76_v8 = vld [vmem:[%s2789_s0 + $0x30] sm:$0xff]  ;;  %v2431_v11 = vmov 0.0|0.0   ;;  %vm2432_vm2 = vmmov 0   ;;  %v2433_v14 = vmov 0.0  }
  0x29   :  { %1980 = vmatprep.mubr.msk.f32.mxu0 %vm84_vm1, %v70_v1  ;;  %v74_v3 = vld [vmem:[%s2789_s0 + $0x20] sm:$0xff]  ;;  %1979 = vmatpush3.msk.msra.mxu0 %vm109_vm0, %v64_v0  ;;  %v75_v5 = vld [vmem:[%s2789_s0 + $0x28] sm:$0xff]  ;;  %v67_v9 = vld [vmem:[%s2791_s2 + $0x10] sm:$0xff]  ;;  %vm218_vm3 = vcmask 261120  }
  0x2a   :  { %v65_v4 = vld [vmem:[%s2791_s2] sm:$0xff]  ;;  %v66_v6 = vld [vmem:[%s2791_s2 + $0x8] sm:$0xff]  ;;  %1981 = vmatmul.mubr.msk.f32.vlgmr.msra.gmra.mrb[0].mxu0 %vm84_vm1, %v71_v2  ;;  %2321 = vmatpush3.msk.msra.mxu1 %vm109_vm0, %v64_v0  ;;  %v68_v10 = vld [vmem:[%s2791_s2 + $0x18] sm:$0xff] }
  0x2b   :  { %v2544_v7 = vpack.c.bf16 %v66_v6, %v65_v4  ;;  %1986 = vmatprep.mubr.msk.f32.mxu1 %vm84_vm1, %v74_v3  ;;  %2208 = vmatprep.subr.bf16.mxu1 %v2431_v11  ;;  %v77_v12 = vld [vmem:[%s2789_s0 + $0x38] sm:$0xff]  ;;  %v2564_v13 = vpack.c.bf16 %v68_v10, %v67_v9  ;;  %v72_v15 = vld [vmem:[%s2789_s0 + $0x10] sm:$0xff]  ;;  %v1823_v17 = vld [vmem:[%s2792_s3] ss:$0 sm:$0xff] }
  0x2c   :  { %1987 = vmatmul.mubr.msk.f32.vlgmr.msra.gmra.mrb[0].mxu1 %vm84_vm1, %v75_v5  ;;  %2220 = vmatprep.subr.bf16.mxu0 %v2431_v11  ;;  %v73_v16 = vld [vmem:[%s2789_s0 + $0x18] sm:$0xff]  ;;  %v858_v59 = vld [vmem:[%s2793_s4] sm:$0xff]  ;;  %v859_v60 = vld [vmem:[%s2793_s4 + $0x8] sm:$0xff] }
  0x2d   :  { %2210 = vmatpush3.bf16.msra.mxu1 %v2544_v7  ;;  %1989 = vmatprep.mubr.msk.f32.mxu1 %vm84_vm1, %v76_v8  ;;  %v2256_v61 = vpack.c.bf16 %v859_v60, %v858_v59  ;;  %v860_v0 = vld [vmem:[%s2793_s4 + $0x10] sm:$0xff]  ;;  %v861_v1 = vld [vmem:[%s2793_s4 + $0x18] sm:$0xff] }
  0x2e   :  { %2211 = vmatprep.subr.bf16.mxu1 %v2431_v11  ;;  %2222 = vmatpush3.bf16.msra.mxu0 %v2544_v7  ;;  %v2260_v5 = vpack.c.bf16 %v861_v1, %v860_v0 }
  0x2f   :  { %2223 = vmatprep.subr.bf16.mxu0 %v2431_v11  ;;  %1983 = vmatprep.mubr.msk.f32.mxu0 %vm84_vm1, %v72_v15  ;;  %v863_v15 = vld [vmem:[#allocation4 + $0x8] sm:$0xff] }
  0x30   :  { %1990 = vmatmul.mubr.msk.f32.gmra.mrb[2].mxu1 %vm84_vm1, %v77_v12  ;;  %1984 = vmatmul.mubr.msk.f32.gmra.mrb[2].mxu0 %vm84_vm1, %v73_v16 }
  0x31   :  { %2213 = vmatpush3.bf16.msra.mxu1 %v2564_v13  ;;  %2000 = vmatprep.mubr.msk.f32.mxu1 %vm2432_vm2, %v2433_v14 }
  0x32   :  { %2214 = vmatprep.subr.bf16.mxu1 %v2431_v11  ;;  %2225 = vmatpush3.bf16.msra.mxu0 %v2564_v13 }
  0x33   :  { %2232 = vmatprep.subr.bf16.mxu0 %v2431_v11  ;;  %2022 = vmatprep.mubr.msk.f32.mxu0 %vm2432_vm2, %v2433_v14 }
  0x34   :  { %2001 = vmatmul.mubr.f32.vlgmr.msra.gmra.mrb[4].mxu1 %v2433_v14 }
  0x35   :  { %2216 = vmatpush3.bf16.msra.mxu1 %v2544_v7  ;;  %2011 = vmatprep.mubr.msk.f32.mxu1 %vm2432_vm2, %v2433_v14 }
  0x36   :  { %2217 = vmatprep.subr.bf16.mxu1 %v2431_v11 }
  0x39   :  { %2219 = vmatpush3.bf16.msra.mxu1 %v2564_v13 }
  0x3a   :  { %2226 = vmatprep.subr.bf16.mxu1 %v2431_v11 }
  0xfd   :  { %v1982_v18 = vpop.f32.mrb[0].mxu0 }
  0xfe   :  { %v185_v19 = vadd.f32 %v1982_v18, %v1823_v17  ;;  %v179_v20 = vpop.f32.mrb[1].mxu0  ;;  %v865_v18 = vld [vmem:[#allocation4 + $0x18] sm:$0xff] }
  0xff   :  { %v180_v21 = vadd.f32 %v1823_v17, %v179_v20  ;;  %v1988_v22 = vpop.f32.mrb[0].mxu1 }
 0x100   :  { %220 = vst.msk [vmem:[#allocation2 + $0x8] sm:$0xff] %vm218_vm3, %v185_v19  ;;  %v205_v23 = vadd.f32 %v1988_v22, %v1823_v17  ;;  %v199_v24 = vpop.f32.mrb[1].mxu1 }
 0x101   :  { %219 = vst.msk [vmem:[#allocation2] sm:$0xff] %vm218_vm3, %v180_v21  ;;  %v200_v25 = vadd.f32 %v1823_v17, %v199_v24 }
 0x102   :  { %224 = vst.msk [vmem:[#allocation2 + $0x28] sm:$0xff] %vm218_vm3, %v205_v23 }
 0x103   :  { %223 = vst.msk [vmem:[#allocation2 + $0x20] sm:$0xff] %vm218_vm3, %v200_v25  ;;  %v1991_v26 = vpop.f32.mrb[2].mxu1  ;;  %v1985_v35 = vpop.f32.mrb[2].mxu0  ;;  %v1840_v25 = vld [vmem:[%s2795_s6] ss:$0 sm:$0xff] }
 0x104   :  { %v215_v27 = vadd.f32 %v1991_v26, %v1823_v17  ;;  %v209_v28 = vpop.f32.mrb[3].mxu1  ;;  %v195_v36 = vadd.f32 %v1985_v35, %v1823_v17  ;;  %v189_v37 = vpop.f32.mrb[3].mxu0 }
 0x105   :  { %v210_v29 = vadd.f32 %v1823_v17, %v209_v28  ;;  %v190_v38 = vadd.f32 %v1823_v17, %v189_v37  ;;  %v864_v17 = vld [vmem:[#allocation4 + $0x10] sm:$0xff] }
 0x106   :  { %226 = vst.msk [vmem:[#allocation2 + $0x38] sm:$0xff] %vm218_vm3, %v215_v27  ;;  %222 = vst.msk [vmem:[#allocation2 + $0x18] sm:$0xff] %vm218_vm3, %v195_v36  ;;  %v2668_v19 = vpack.c.bf16 %v865_v18, %v864_v17  ;;  %v1643_v18 = vld [vmem:[#allocation7 + $0x10] sm:$0xff] }
 0x107   :  { %225 = vst.msk [vmem:[#allocation2 + $0x30] sm:$0xff] %vm218_vm3, %v210_v29  ;;  %v297_v30 = vpop.f32.mrb[4].mxu1  ;;  %221 = vst.msk [vmem:[#allocation2 + $0x10] sm:$0xff] %vm218_vm3, %v190_v38  ;;  %v305_v39 = vld [vmem:[#allocation2 + $0x8] sm:$0xff] }
 0x108   :  { %v227_v31 = vld [vmem:[#allocation2] sm:$0xff]  ;;  %v2002_v32 = vpop.f32.mrb[5].mxu1 }
 0x109   :  { %v301_v33 = vadd.f32 %v297_v30, %v227_v31  ;;  %v621_v62 = vld [vmem:[#allocation2 + $0x28] sm:$0xff] }
 0x10a   :  { %v542_v54 = vld [vmem:[#allocation2 + $0x20] sm:$0xff] }
 0x10b   :  { %v302_v34 = vmax.f32 %v301_v33, 0.0 }
 0x10d   :  { %303 = vst.msk [vmem:[#allocation3] sm:$0xff] %vm218_vm3, %v302_v34  ;;  %2012 = vmatmul.mubr.msk.f32.vlgmr.msra.gmra.mrb[6].mxu1 %vm218_vm3, %v302_v34  ;;  %v463_v49 = vld [vmem:[#allocation2 + $0x18] sm:$0xff] }
 0x10e   :  { %2228 = vmatpush3.bf16.msra.mxu1 %v2544_v7  ;;  %2033 = vmatprep.mubr.msk.f32.mxu1 %vm2432_vm2, %v2433_v14  ;;  %v384_v44 = vld [vmem:[#allocation2 + $0x10] sm:$0xff] }
 0x10f   :  { %2229 = vmatprep.subr.bf16.mxu1 %v2431_v11  ;;  %v700_v20 = vld [vmem:[#allocation2 + $0x30] sm:$0xff] }
 0x112   :  { %2231 = vmatpush3.bf16.msra.mxu1 %v2564_v13 }
 0x113   :  { %2238 = vmatprep.subr.bf16.mxu1 %v2431_v11 }
 0x114   :  { %v867_v6 = vld [vmem:[#allocation3] sm:$0xff] }
 0x1e0   :  { %v375_v40 = vpop.f32.mrb[6].mxu1 }
 0x1e1   :  { %v379_v41 = vadd.f32 %v375_v40, %v305_v39  ;;  %v2013_v42 = vpop.f32.mrb[7].mxu1  ;;  %v779_v39 = vld [vmem:[#allocation2 + $0x38] sm:$0xff] }
 0x1e3   :  { %v380_v43 = vmax.f32 %v379_v41, 0.0 }
 0x1e5   :  { %382 = vst.msk [vmem:[#allocation3 + $0x8] sm:$0xff] %vm218_vm3, %v380_v43  ;;  %2023 = vmatmul.mubr.msk.f32.vlgmr.msra.gmra.mrb[4].mxu0 %vm218_vm3, %v380_v43 }
 0x1e6   :  { %2234 = vmatpush3.bf16.msra.mxu0 %v2544_v7  ;;  %2044 = vmatprep.mubr.msk.f32.mxu0 %vm2432_vm2, %v2433_v14 }
 0x1e7   :  { %2235 = vmatprep.subr.bf16.mxu0 %v2431_v11 }
 0x1ea   :  { %2237 = vmatpush3.bf16.msra.mxu0 %v2564_v13 }
 0x1eb   :  { %2244 = vmatprep.subr.bf16.mxu0 %v2431_v11 }
 0x2b8   :  { %v454_v45 = vpop.f32.mrb[4].mxu0 }
 0x2b9   :  { %v458_v46 = vadd.f32 %v454_v45, %v384_v44  ;;  %v2024_v47 = vpop.f32.mrb[5].mxu0 }
 0x2bb   :  { %v459_v48 = vmax.f32 %v458_v46, 0.0 }
 0x2bd   :  { %461 = vst.msk [vmem:[#allocation3 + $0x10] sm:$0xff] %vm218_vm3, %v459_v48  ;;  %2034 = vmatmul.mubr.msk.f32.vlgmr.msra.gmra.mrb[8].mxu1 %vm218_vm3, %v459_v48 }
 0x2be   :  { %2240 = vmatpush3.bf16.msra.mxu1 %v2544_v7  ;;  %2055 = vmatprep.mubr.msk.f32.mxu1 %vm2432_vm2, %v2433_v14 }
 0x2bf   :  { %2241 = vmatprep.subr.bf16.mxu1 %v2431_v11 }
 0x2c2   :  { %2243 = vmatpush3.bf16.msra.mxu1 %v2564_v13 }
 0x2c3   :  { %2250 = vmatprep.subr.bf16.mxu1 %v2431_v11 }
 0x2c4   :  { %v869_v8 = vld [vmem:[#allocation3 + $0x10] sm:$0xff] }
 0x390   :  { %v533_v50 = vpop.f32.mrb[8].mxu1 }
 0x391   :  { %v537_v51 = vadd.f32 %v533_v50, %v463_v49  ;;  %v2035_v52 = vpop.f32.mrb[9].mxu1 }
 0x393   :  { %v538_v53 = vmax.f32 %v537_v51, 0.0 }
 0x395   :  { %540 = vst.msk [vmem:[#allocation3 + $0x18] sm:$0xff] %vm218_vm3, %v538_v53  ;;  %2045 = vmatmul.mubr.msk.f32.vlgmr.msra.gmra.mrb[6].mxu0 %vm218_vm3, %v538_v53 }
 0x396   :  { %2246 = vmatpush3.bf16.msra.mxu0 %v2544_v7  ;;  %2066 = vmatprep.mubr.msk.f32.mxu0 %vm2432_vm2, %v2433_v14 }
 0x397   :  { %2247 = vmatprep.subr.bf16.mxu0 %v2431_v11 }
 0x39a   :  { %2249 = vmatpush3.bf16.msra.mxu0 %v2564_v13 }
 0x39b   :  { %2257 = vmatprep.subr.bf16.mxu0 %v2256_v61 }
 0x39c   :  { %v870_v9 = vld [vmem:[#allocation3 + $0x18] sm:$0xff] }
 0x468   :  { %v612_v55 = vpop.f32.mrb[6].mxu0 }
 0x469   :  { %v616_v56 = vadd.f32 %v612_v55, %v542_v54  ;;  %v2046_v57 = vpop.f32.mrb[7].mxu0 }
 0x46b   :  { %v617_v58 = vmax.f32 %v616_v56, 0.0 }
 0x46d   :  { %619 = vst.msk [vmem:[#allocation3 + $0x20] sm:$0xff] %vm218_vm3, %v617_v58  ;;  %2056 = vmatmul.mubr.msk.f32.vlgmr.msra.gmra.mrb[10].mxu1 %vm218_vm3, %v617_v58 }
 0x46e   :  { %2252 = vmatpush3.bf16.msra.mxu1 %v2544_v7  ;;  %2077 = vmatprep.mubr.msk.f32.mxu1 %vm2432_vm2, %v2433_v14  ;;  %v868_v7 = vld [vmem:[#allocation3 + $0x8] sm:$0xff] }
 0x46f   :  { %2253 = vmatprep.subr.bf16.mxu1 %v2431_v11 }
 0x472   :  { %2255 = vmatpush3.bf16.msra.mxu1 %v2564_v13  ;;  %v862_v13 = vld [vmem:[#allocation4] sm:$0xff] }
 0x473   :  { %2264 = vmatprep.subr.bf16.mxu1 %v2431_v11  ;;  %v2664_v16 = vpack.c.bf16 %v863_v15, %v862_v13 }
 0x474   :  { %v871_v10 = vld [vmem:[#allocation3 + $0x20] sm:$0xff] }
 0x540   :  { %v691_v63 = vpop.f32.mrb[10].mxu1 }
 0x541   :  { %v695_v2 = vadd.f32 %v691_v63, %v621_v62  ;;  %v2057_v3 = vpop.f32.mrb[11].mxu1 }
 0x543   :  { %v696_v4 = vmax.f32 %v695_v2, 0.0 }
 0x545   :  { %698 = vst.msk [vmem:[#allocation3 + $0x28] sm:$0xff] %vm218_vm3, %v696_v4  ;;  %2067 = vmatmul.mubr.msk.f32.vlgmr.msra.gmra.mrb[8].mxu0 %vm218_vm3, %v696_v4 }
 0x546   :  { %2259 = vmatpush3.bf16.msra.mxu0 %v2256_v61  ;;  %2088 = vmatprep.mubr.msk.f32.mxu0 %vm218_vm3, %v867_v6 }
 0x547   :  { %2261 = vmatprep.subr.bf16.mxu0 %v2260_v5 }
 0x54a   :  { %2263 = vmatpush3.bf16.msra.mxu0 %v2260_v5 }
 0x54b   :  { %2276 = vmatprep.subr.bf16.mxu0 %v2431_v11 }
 0x54c   :  { %v872_v12 = vld [vmem:[#allocation3 + $0x28] sm:$0xff] }
 0x54d   :  { %2089 = vmatmul.mubr.msk.f32.vlgmr.msra.gmra.mrb[10].mxu0 %vm218_vm3, %v868_v7 }
 0x54e   :  { %2091 = vmatprep.mubr.msk.f32.mxu0 %vm218_vm3, %v869_v8  ;;  %2278 = vmatpush3.bf16.msra.mxu0 %v2664_v16 }
 0x54f   :  { %2279 = vmatprep.subr.bf16.mxu0 %v2431_v11 }
 0x551   :  { %2092 = vmatmul.mubr.msk.f32.gmra.mrb[12].mxu0 %vm218_vm3, %v870_v9 }
 0x552   :  { %2094 = vmatprep.mubr.msk.f32.mxu0 %vm218_vm3, %v871_v10  ;;  %2281 = vmatpush3.bf16.msra.mxu0 %v2668_v19  ;;  %v1641_v10 = vld [vmem:[#allocation7] sm:$0xff] }
 0x553   :  { %2288 = vmatprep.subr.bf16.mxu0 %v2431_v11 }
 0x555   :  { %2095 = vmatmul.mubr.msk.f32.gmra.mrb[14].mxu0 %vm218_vm3, %v872_v12  ;;  %v1642_v12 = vld [vmem:[#allocation7 + $0x8] sm:$0xff] }
 0x556   :  { %v2312_v13 = vpack.c.bf16 %v1642_v12, %v1641_v10 }
 0x618   :  { %v770_v21 = vpop.f32.mrb[8].mxu0 }
 0x619   :  { %v774_v22 = vadd.f32 %v770_v21, %v700_v20  ;;  %v2068_v23 = vpop.f32.mrb[9].mxu0  ;;  %v1644_v20 = vld [vmem:[#allocation7 + $0x18] sm:$0xff] }
 0x61b   :  { %v775_v24 = vmax.f32 %v774_v22, 0.0 }
 0x61d   :  { %777 = vst.msk [vmem:[#allocation3 + $0x30] sm:$0xff] %vm218_vm3, %v775_v24  ;;  %2078 = vmatmul.mubr.msk.f32.vlgmr.msra.gmra.mrb[12].mxu1 %vm218_vm3, %v775_v24  ;;  %v2316_v24 = vpack.c.bf16 %v1644_v20, %v1643_v18 }
 0x61e   :  { %2266 = vmatpush3.bf16.msra.mxu1 %v2664_v16  ;;  %2108 = vmatprep.mubr.msk.f32.mxu1 %vm2432_vm2, %v2433_v14 }
 0x61f   :  { %2267 = vmatprep.subr.bf16.mxu1 %v2431_v11 }
 0x620   :  { %v2090_v26 = vpop.f32.mrb[10].mxu0 }
 0x621   :  { %v977_v27 = vadd.f32 %v2090_v26, %v1840_v25  ;;  %v971_v28 = vpop.f32.mrb[11].mxu0 }
 0x622   :  { %v972_v29 = vadd.f32 %v1840_v25, %v971_v28  ;;  %2269 = vmatpush3.bf16.msra.mxu1 %v2668_v19 }
 0x623   :  { %1011 = vst.msk [vmem:[#allocation2 + $0x8] sm:$0xff] %vm218_vm3, %v977_v27  ;;  %2270 = vmatprep.subr.bf16.mxu1 %v2431_v11 }
 0x624   :  { %1010 = vst.msk [vmem:[#allocation2] sm:$0xff] %vm218_vm3, %v972_v29  ;;  %v2093_v30 = vpop.f32.mrb[12].mxu0  ;;  %v873_v31 = vld [vmem:[#allocation3 + $0x30] sm:$0xff] }
 0x625   :  { %v987_v32 = vadd.f32 %v2093_v30, %v1840_v25  ;;  %v981_v33 = vpop.f32.mrb[13].mxu0  ;;  %2109 = vmatmul.mubr.f32.vlgmr.msra.gmra.mrb[14].mxu1 %v2433_v14  ;;  %2097 = vmatprep.mubr.msk.f32.mxu0 %vm218_vm3, %v873_v31 }
 0x626   :  { %v982_v34 = vadd.f32 %v1840_v25, %v981_v33  ;;  %2272 = vmatpush3.bf16.msra.mxu1 %v2664_v16  ;;  %2119 = vmatprep.mubr.msk.f32.mxu1 %vm2432_vm2, %v2433_v14 }
 0x627   :  { %1013 = vst.msk [vmem:[#allocation2 + $0x18] sm:$0xff] %vm218_vm3, %v987_v32  ;;  %2273 = vmatprep.subr.bf16.mxu1 %v2431_v11  ;;  %v1856_v32 = vld [vmem:[%s2797_s8] ss:$0 sm:$0xff]  ;;  %s2434_s8 = smov [#allocation10]  }
 0x628   :  { %1012 = vst.msk [vmem:[#allocation2 + $0x10] sm:$0xff] %vm218_vm3, %v982_v34  ;;  %v2096_v35 = vpop.f32.mrb[14].mxu0  ;;  %s1806_s12 = sshll.u32 %s2434_s8, 4  ;;  %s1807_s12 = int_to_ptr.vmem [resolvable:$true] %s1806_s12 }
 0x629   :  { %v997_v36 = vadd.f32 %v2096_v35, %v1840_v25  ;;  %v991_v37 = vpop.f32.mrb[15].mxu0  ;;  %s2375_s13 = scalar_lea.vmem %s1807_s12, 256  ;;  %p2380_p3 = scmp.lt.s32.totalorder %s1807_s12, %s1807_s12 }
 0x62a   :  { %v992_v38 = vadd.f32 %v1840_v25, %v991_v37  ;;  %2275 = vmatpush3.bf16.msra.mxu1 %v2668_v19  ;;  %v1092_v50 = vld [vmem:[#allocation2 + $0x8] sm:$0xff]  ;;  %p2376_p2 = scmp.ne.s32.totalorder %s1807_s12, %s2375_s13  ;;  %p2381_p4 = scmp.lt.s32.totalorder %s2375_s13, %s2375_s13 }
 0x62b   :  { %1015 = vst.msk [vmem:[#allocation2 + $0x28] sm:$0xff] %vm218_vm3, %v997_v36  ;;  %2282 = vmatprep.subr.bf16.mxu1 %v2431_v11  ;;  %v1018_v44 = vld [vmem:[#allocation2] sm:$0xff] }
 0x62c   :  { %1014 = vst.msk [vmem:[#allocation2 + $0x20] sm:$0xff] %vm218_vm3, %v992_v38  ;;  %p2382_p5 = por %p2381_p4, %p2380_p3 }
 0x62e   :  { %v1246_v0 = vld [vmem:[#allocation2 + $0x18] sm:$0xff]  ;;  %p2383_p6 = pnand %p2382_p5, %p2376_p2 }
 0x62f   :  { %v1169_v59 = vld [vmem:[#allocation2 + $0x10] sm:$0xff] }
 0x632   :  { %v1400_v15 = vld [vmem:[#allocation2 + $0x28] sm:$0xff] }
 0x633   :  { %v1323_v5 = vld [vmem:[#allocation2 + $0x20] sm:$0xff] }
 0x6f0   :  { %v849_v40 = vpop.f32.mrb[12].mxu1 }
 0x6f1   :  { %v853_v41 = vadd.f32 %v849_v40, %v779_v39  ;;  %v2079_v42 = vpop.f32.mrb[13].mxu1 }
 0x6f3   :  { %v854_v43 = vmax.f32 %v853_v41, 0.0 }
 0x6f5   :  { %856 = vst.msk [vmem:[#allocation3 + $0x38] sm:$0xff] %vm218_vm3, %v854_v43  ;;  %857 = vst.msk [vmem:[#allocation10] sm:$0xff] %vm218_vm3, %v854_v43 }
 0x6f8   :  { %v1085_v45 = vpop.f32.mrb[14].mxu1 }
 0x6f9   :  { %v1089_v46 = vadd.f32 %v1085_v45, %v1018_v44  ;;  %v2110_v47 = vpop.f32.mrb[15].mxu1 }
 0x6fb   :  { %v1090_v48 = vmax.f32 %v1089_v46, 0.0 }
 0x6fc   :  { %v874_v49 = vld [vmem:[#allocation3 + $0x38] sm:$0xff] }
 0x6fd   :  { %1091 = vst.msk [vmem:[#allocation3] sm:$0xff] %vm218_vm3, %v1090_v48  ;;  %2120 = vmatmul.mubr.msk.f32.vlgmr.msra.gmra.mrb[16].mxu1 %vm218_vm3, %v1090_v48  ;;  %2098 = vmatmul.mubr.msk.f32.gmra.mrb[16].mxu0 %vm218_vm3, %v874_v49 }
 0x6fe   :  { %2130 = vmatprep.mubr.msk.f32.mxu0 %vm2432_vm2, %v2433_v14  ;;  %2284 = vmatpush3.bf16.msra.mxu1 %v2664_v16 }
 0x6ff   :  { %2285 = vmatprep.subr.bf16.mxu1 %v2431_v11  ;;  %2141 = vmatprep.mubr.msk.f32.mxu1 %vm2432_vm2, %v2433_v14 }
 0x702   :  { %2287 = vmatpush3.bf16.msra.mxu1 %v2668_v19 }
 0x703   :  { %2294 = vmatprep.subr.bf16.mxu1 %v2431_v11 }
 0x7d0   :  { %v1162_v51 = vpop.f32.mrb[16].mxu1  ;;  %v2099_v52 = vpop.f32.mrb[16].mxu0 }
 0x7d1   :  { %v1166_v53 = vadd.f32 %v1162_v51, %v1092_v50  ;;  %v1007_v54 = vadd.f32 %v2099_v52, %v1840_v25  ;;  %v2121_v55 = vpop.f32.mrb[17].mxu1  ;;  %v1001_v56 = vpop.f32.mrb[17].mxu0 }
 0x7d2   :  { %v1002_v57 = vadd.f32 %v1840_v25, %v1001_v56 }
 0x7d3   :  { %v1167_v58 = vmax.f32 %v1166_v53, 0.0  ;;  %1017 = vst.msk [vmem:[#allocation2 + $0x38] sm:$0xff] %vm218_vm3, %v1007_v54 }
 0x7d4   :  { %1016 = vst.msk [vmem:[#allocation2 + $0x30] sm:$0xff] %vm218_vm3, %v1002_v57 }
 0x7d5   :  { %1168 = vst.msk [vmem:[#allocation3 + $0x8] sm:$0xff] %vm218_vm3, %v1167_v58  ;;  %2131 = vmatmul.mubr.msk.f32.vlgmr.msra.gmra.mrb[18].mxu0 %vm218_vm3, %v1167_v58 }
 0x7d6   :  { %2290 = vmatpush3.bf16.msra.mxu0 %v2664_v16  ;;  %2152 = vmatprep.mubr.msk.f32.mxu0 %vm2432_vm2, %v2433_v14 }
 0x7d7   :  { %2291 = vmatprep.subr.bf16.mxu0 %v2431_v11 }
 0x7da   :  { %2293 = vmatpush3.bf16.msra.mxu0 %v2668_v19  ;;  %v1554_v46 = vld [vmem:[#allocation2 + $0x38] sm:$0xff] }
 0x7db   :  { %2300 = vmatprep.subr.bf16.mxu0 %v2431_v11  ;;  %v1477_v27 = vld [vmem:[#allocation2 + $0x30] sm:$0xff] }
 0x8a8   :  { %v1239_v60 = vpop.f32.mrb[18].mxu0 }
 0x8a9   :  { %v1243_v61 = vadd.f32 %v1239_v60, %v1169_v59  ;;  %v2132_v62 = vpop.f32.mrb[19].mxu0 }
 0x8ab   :  { %v1244_v63 = vmax.f32 %v1243_v61, 0.0 }
 0x8ad   :  { %1245 = vst.msk [vmem:[#allocation3 + $0x10] sm:$0xff] %vm218_vm3, %v1244_v63  ;;  %2142 = vmatmul.mubr.msk.f32.vlgmr.msra.gmra.mrb[18].mxu1 %vm218_vm3, %v1244_v63 }
 0x8ae   :  { %2296 = vmatpush3.bf16.msra.mxu1 %v2664_v16  ;;  %2163 = vmatprep.mubr.msk.f32.mxu1 %vm2432_vm2, %v2433_v14 }
 0x8af   :  { %2297 = vmatprep.subr.bf16.mxu1 %v2431_v11 }
 0x8b2   :  { %2299 = vmatpush3.bf16.msra.mxu1 %v2668_v19 }
 0x8b3   :  { %2306 = vmatprep.subr.bf16.mxu1 %v2431_v11 }
 0x980   :  { %v1316_v1 = vpop.f32.mrb[18].mxu1 }
 0x981   :  { %v1320_v2 = vadd.f32 %v1316_v1, %v1246_v0  ;;  %v2143_v3 = vpop.f32.mrb[19].mxu1 }
 0x983   :  { %v1321_v4 = vmax.f32 %v1320_v2, 0.0 }
 0x985   :  { %1322 = vst.msk [vmem:[#allocation3 + $0x18] sm:$0xff] %vm218_vm3, %v1321_v4  ;;  %2153 = vmatmul.mubr.msk.f32.vlgmr.msra.gmra.mrb[20].mxu0 %vm218_vm3, %v1321_v4 }
 0x986   :  { %2302 = vmatpush3.bf16.msra.mxu0 %v2664_v16  ;;  %2174 = vmatprep.mubr.msk.f32.mxu0 %vm2432_vm2, %v2433_v14 }
 0x987   :  { %2303 = vmatprep.subr.bf16.mxu0 %v2431_v11 }
 0x98a   :  { %2305 = vmatpush3.bf16.msra.mxu0 %v2668_v19 }
 0x98b   :  { %2313 = vmatprep.subr.bf16.mxu0 %v2312_v13 }
 0xa58   :  { %v1393_v6 = vpop.f32.mrb[20].mxu0 }
 0xa59   :  { %v1397_v7 = vadd.f32 %v1393_v6, %v1323_v5  ;;  %v2154_v8 = vpop.f32.mrb[21].mxu0 }
 0xa5b   :  { %v1398_v9 = vmax.f32 %v1397_v7, 0.0 }
 0xa5d   :  { %1399 = vst.msk [vmem:[#allocation3 + $0x20] sm:$0xff] %vm218_vm3, %v1398_v9  ;;  %2164 = vmatmul.mubr.msk.f32.vlgmr.msra.gmra.mrb[20].mxu1 %vm218_vm3, %v1398_v9 }
 0xa5e   :  { %2308 = vmatpush3.bf16.msra.mxu1 %v2664_v16  ;;  %2185 = vmatprep.mubr.msk.f32.mxu1 %vm2432_vm2, %v2433_v14  ;;  %v1633_v14 = vld [vmem:[#allocation3] sm:$0xff]  ;;  %v1635_v16 = vld [vmem:[#allocation3 + $0x10] sm:$0xff] }
 0xa5f   :  { %2309 = vmatprep.subr.bf16.mxu1 %v2431_v11  ;;  %v1634_v11 = vld [vmem:[#allocation3 + $0x8] sm:$0xff] }
 0xa62   :  { %2311 = vmatpush3.bf16.msra.mxu1 %v2668_v19  ;;  %v1636_v19 = vld [vmem:[#allocation3 + $0x18] sm:$0xff] }
 0xa64   :  { %v1637_v25 = vld [vmem:[#allocation3 + $0x20] sm:$0xff] }
 0xb30   :  { %v1470_v17 = vpop.f32.mrb[20].mxu1 }
 0xb31   :  { %v1474_v21 = vadd.f32 %v1470_v17, %v1400_v15  ;;  %v2165_v22 = vpop.f32.mrb[21].mxu1 }
 0xb33   :  { %v1475_v23 = vmax.f32 %v1474_v21, 0.0 }
 0xb35   :  { %1476 = vst.msk [vmem:[#allocation3 + $0x28] sm:$0xff] %vm218_vm3, %v1475_v23  ;;  %2175 = vmatmul.mubr.msk.f32.vlgmr.msra.gmra.mrb[22].mxu0 %vm218_vm3, %v1475_v23 }
 0xb36   :  { %2315 = vmatpush3.bf16.msra.mxu0 %v2312_v13  ;;  %2196 = vmatprep.mubr.msk.f32.mxu0 %vm218_vm3, %v1633_v14 }
 0xb37   :  { %2317 = vmatprep.subr.bf16.mxu0 %v2316_v24 }
 0xb3a   :  { %2319 = vmatpush3.bf16.msra.mxu0 %v2316_v24 }
 0xb3c   :  { %v1638_v26 = vld [vmem:[#allocation3 + $0x28] sm:$0xff] }
 0xb3d   :  { %2197 = vmatmul.mubr.msk.f32.vlgmr.msra.gmra.mrb[24].mxu0 %vm218_vm3, %v1634_v11 }
 0xb3e   :  { %2199 = vmatprep.mubr.msk.f32.mxu0 %vm218_vm3, %v1635_v16 }
 0xb41   :  { %2200 = vmatmul.mubr.msk.f32.gmra.mrb[26].mxu0 %vm218_vm3, %v1636_v19 }
 0xb42   :  { %2202 = vmatprep.mubr.msk.f32.mxu0 %vm218_vm3, %v1637_v25 }
 0xb45   :  { %2203 = vmatmul.mubr.msk.f32.gmra.mrb[28].mxu0 %vm218_vm3, %v1638_v26 }
 0xc08   :  { %v1547_v28 = vpop.f32.mrb[22].mxu0 }
 0xc09   :  { %v1551_v29 = vadd.f32 %v1547_v28, %v1477_v27  ;;  %v2176_v30 = vpop.f32.mrb[23].mxu0 }
 0xc0b   :  { %v1552_v31 = vmax.f32 %v1551_v29, 0.0 }
 0xc0d   :  { %1553 = vst.msk [vmem:[#allocation3 + $0x30] sm:$0xff] %vm218_vm3, %v1552_v31  ;;  %2186 = vmatmul.mubr.msk.f32.vlgmr.msra.gmra.mrb[22].mxu1 %vm218_vm3, %v1552_v31 }
 0xc10   :  { %v2198_v33 = vpop.f32.mrb[24].mxu0 }
 0xc11   :  { %v1748_v34 = vadd.f32 %v2198_v33, %v1856_v32  ;;  %v1742_v35 = vpop.f32.mrb[25].mxu0 }
 0xc12   :  { %v1743_v36 = vadd.f32 %v1856_v32, %v1742_v35 }
 0xc13   :  { %1782 = vst [vmem:[#allocation9 + $0x8] sm:$0xff] %v1748_v34 }
 0xc14   :  { %1781 = vst [vmem:[#allocation9] sm:$0xff] %v1743_v36  ;;  %v2201_v37 = vpop.f32.mrb[26].mxu0  ;;  %v1639_v38 = vld [vmem:[#allocation3 + $0x30] sm:$0xff] }
 0xc15   :  { %v1758_v39 = vadd.f32 %v2201_v37, %v1856_v32  ;;  %v1752_v40 = vpop.f32.mrb[27].mxu0  ;;  %2205 = vmatprep.mubr.msk.f32.mxu0 %vm218_vm3, %v1639_v38 }
 0xc16   :  { %v1753_v41 = vadd.f32 %v1856_v32, %v1752_v40 }
 0xc17   :  { %1784 = vst [vmem:[#allocation9 + $0x18] sm:$0xff] %v1758_v39 }
 0xc18   :  { %1783 = vst [vmem:[#allocation9 + $0x10] sm:$0xff] %v1753_v41  ;;  %v2204_v42 = vpop.f32.mrb[28].mxu0 }
 0xc19   :  { %v1768_v43 = vadd.f32 %v2204_v42, %v1856_v32  ;;  %v1762_v44 = vpop.f32.mrb[29].mxu0 }
 0xc1a   :  { %v1763_v45 = vadd.f32 %v1856_v32, %v1762_v44 }
 0xc1b   :  { %1786 = vst [vmem:[#allocation9 + $0x28] sm:$0xff] %v1768_v43 }
 0xc1c   :  { %1785 = vst [vmem:[#allocation9 + $0x20] sm:$0xff] %v1763_v45 }
 0xce0   :  { %v1624_v47 = vpop.f32.mrb[22].mxu1 }
 0xce1   :  { %v1628_v48 = vadd.f32 %v1624_v47, %v1554_v46  ;;  %v2187_v49 = vpop.f32.mrb[23].mxu1 }
 0xce3   :  { %v1629_v50 = vmax.f32 %v1628_v48, 0.0 }
 0xce5   :  { %1630 = vst.msk [vmem:[#allocation3 + $0x38] sm:$0xff] %vm218_vm3, %v1629_v50  ;;  %1632 = vst.msk [vmem:[#allocation10 + $0x8] sm:$0xff] %vm218_vm3, %v1629_v50 }
 0xcec   :  { %v1640_v51 = vld [vmem:[#allocation3 + $0x38] sm:$0xff] }
 0xced   :  { %2206 = vmatmul.mubr.msk.f32.gmra.mrb[30].mxu0 %vm218_vm3, %v1640_v51 }
 0xcee   :  { %2386 = shalt.err (!%p2383_p6)
}
 0xcef   :  { %s2387_s17 = scalar_lea.hbm %s2799_s10, 256 }
 0xcf0   :  { %p2388_p7 = scmp.ne.s32.totalorder %s2799_s10, %s2387_s17  ;;  %p2391_p8 = scmp.lt.u32.totalorder %s2387_s17, %s2799_s10 }
 0xcf2   :  { %p2393_p9 = pnand %p2391_p8, %p2388_p7 }
 0xcf4   :  { %2396 = shalt.err (!%p2393_p9)
}
 0xcf5   :  { %1812 = dma.vmem_to_hbm [thread:$0]  %s1807_s12, 256, %s2799_s10, [#allocation11], %s2428_s23, %s2428_s23, %s2429_s24  }
 0xcf6   :  { %s2435_s21 = smov [#allocation9]  }
 0xcf7   :  { %s1794_s22 = sshll.u32 %s2435_s21, 4  ;;  %s1795_s22 = int_to_ptr.vmem [resolvable:$true] %s1794_s22 }
 0xcf8   :  { %s2397_s25 = scalar_lea.vmem %s1795_s22, 1024  ;;  %p2402_p11 = scmp.lt.s32.totalorder %s1795_s22, %s1795_s22 }
 0xcf9   :  { %p2398_p10 = scmp.ne.s32.totalorder %s1795_s22, %s2397_s25  ;;  %p2403_p12 = scmp.lt.s32.totalorder %s2397_s25, %s2397_s25 }
 0xcfb   :  { %p2404_p13 = por %p2403_p12, %p2402_p11 }
 0xcfd   :  { %p2405_p0 = pnand %p2404_p13, %p2398_p10 }
 0xdc0   :  { %v2207_v52 = vpop.f32.mrb[30].mxu0 }
 0xdc1   :  { %v1778_v53 = vadd.f32 %v2207_v52, %v1856_v32  ;;  %v1772_v54 = vpop.f32.mrb[31].mxu0 }
 0xdc2   :  { %v1773_v55 = vadd.f32 %v1856_v32, %v1772_v54 }
 0xdc3   :  { %1788 = vst [vmem:[#allocation9 + $0x38] sm:$0xff] %v1778_v53 }
 0xdc4   :  { %1787 = vst [vmem:[#allocation9 + $0x30] sm:$0xff] %v1773_v55 }
 0xdc5   :  { %2408 = shalt.err (!%p2405_p0)
}
 0xdc6   :  { %s2409_s10 = scalar_lea.hbm %s2798_s9, 1024 }
 0xdc7   :  { %p2410_p1 = scmp.ne.s32.totalorder %s2798_s9, %s2409_s10  ;;  %p2413_p2 = scmp.lt.u32.totalorder %s2409_s10, %s2798_s9 }
 0xdc9   :  { %p2415_p3 = pnand %p2413_p2, %p2410_p1 }
 0xdcb   :  { %2418 = shalt.err (!%p2415_p3)
}
 0xdcc   :  { %1800 = dma.vmem_to_hbm [thread:$0]  %s1795_s22, 1024, %s2798_s9, [#allocation6], %s2428_s23, %s2428_s23, %s2429_s24  }
 0xdcd   :  { %2423 = dma.done.wait [#allocation6], 1024  }
 0xdce   :  { %2424 = vsyncadd [#allocation6], 4294966272 }
 0xdcf   :  { %2425 = dma.done.wait [#allocation11], 256  }
 0xdd0   :  { %2426 = vsyncadd [#allocation11], 4294967040 }
 0xdd1   :  { %1819 = vsyncpa [#allocation5], 1 }
 0xdd2   :  { %1820 = vsyncpa [#allocation8], 1 }
 0xdd3   :  { %1821 = vsyncpa [#allocation6], 1 }
 0xdd4   :  { %1822 = vsyncpa [#allocation11], 1 }

</bundles_post_ra>
